<compile_context>
chip_gen: v7x
topology: tpu7x:2x2x1
jax: 0.10.0
libtpu: 0.0.40
codegen_flags: <defaults>
</compile_context>

<pallas_src>
import math
import functools

import jax
import jax.numpy as jnp
from jax.experimental import pallas as pl
from jax.experimental.pallas import tpu as pltpu


def gtu_kernel(x_ref, w_ref, b_ref, o_ref, *, C, K, S, T_out, TN):
    """x_ref: (1, C, TN, T); w_ref: (K*2C, C); b_ref: (2C, 1); o_ref: (1, C, TN, T_out)."""
    C2 = 2 * C
    w = w_ref[...]                      # hoisted out of the node loop
    b = b_ref[...]

    def process(n):
        xr = x_ref[0, :, n, :]                                   # (C, T)
        # One MXU call per node row: (K*2C, C) @ (C, T) produces both gate
        # halves and all K convolution taps in a single pass over the patch.
        y = jnp.dot(w, xr, preferred_element_type=jnp.float32)   # (K*2C, T)
        # Combine taps: conv[o, t] = bias[o] + sum_k y[k*2C + o, S*t + k]
        r = b                                                    # (2C, 1) -> broadcast
        for k in range(K):
            r = r + y[k * C2:(k + 1) * C2, k:k + S * (T_out - 1) + 1:S]  # (2C, T_out)
        # Gate (EUP/VPU) and store straight into the NCHW output block
        # (time axis on lanes -- no wrapper transpose needed afterwards).
        o_ref[0, :, n, :] = jnp.tanh(r[:C]) * jax.nn.sigmoid(r[C:])

    if TN <= 8:                         # small node blocks: fully unrolled
        for n in range(TN):
            process(n)
    else:                               # large node blocks: rolled loop
        def body(n, carry):
            process(n)
            return carry
        jax.lax.fori_loop(0, TN, body, 0)


def gtu_forward(x, weight, bias, *, time_strides, kernel_size, node_block=256):
    """x: (B, C, N, T) f32; weight: (2C, C, 1, K); bias: (2C,) -> (B, C, N, T_out)."""
    B, C, N, T = x.shape
    K = kernel_size
    S = time_strides
    C2 = 2 * C
    T_out = (T - K) // S + 1

    # Repack Conv2d weight (2C, C, 1, K) -> W_all (K*2C, C), k-major so row
    # k*2C + o holds weight[o, :, 0, k]; bias -> (2C, 1) for lane broadcast.
    # (Tiny arrays: free wrapper-side glue.)
    w_all = jnp.transpose(weight[:, :, 0, :], (2, 0, 1)).reshape(K * C2, C)
    b2 = bias.reshape(C2, 1)

    # Node-axis blocking: TN = N for moderate N (block dim == full dim is
    # always legal); otherwise an 8-aligned block with N padded up to it.
    if N <= node_block:
        TN, Np = N, N
        xp = x
    else:
        TN = node_block                       # multiple of 8
        Np = pl.cdiv(N, TN) * TN
        xp = jnp.pad(x, ((0, 0), (0, 0), (0, Np - N), (0, 0))) if Np != N else x

    kernel = functools.partial(gtu_kernel, C=C, K=K, S=S, T_out=T_out, TN=TN)

    out = pl.pallas_call(
        kernel,
        out_shape=jax.ShapeDtypeStruct((B, C, Np, T_out), jnp.float32),
        grid_spec=pltpu.PrefetchScalarGridSpec(
            num_scalar_prefetch=0,
            grid=(B, Np // TN),
            in_specs=[
                pl.BlockSpec((1, C, TN, T), lambda b, j: (b, 0, j, 0)),   # x window
                pl.BlockSpec((K * C2, C), lambda b, j: (0, 0)),           # fused weight
                pl.BlockSpec((C2, 1), lambda b, j: (0, 0)),               # bias
            ],
            out_specs=pl.BlockSpec((1, C, TN, T_out), lambda b, j: (b, 0, j, 0)),
        ),
        compiler_params=pltpu.CompilerParams(
            dimension_semantics=("parallel", "parallel")),
    )(xp, w_all, b2)

    if Np != N:
        out = out[:, :, :N, :]
    return out


def gtu_reference(x, weight, bias, *, time_strides, kernel_size):
    """Plain-JAX reference (lax conv) for a correctness check."""
    C = x.shape[1]
    conv = jax.lax.conv_general_dilated(
        x, weight, window_strides=(1, time_strides), padding="VALID",
        dimension_numbers=("NCHW", "OIHW", "NCHW"))
    conv = conv + bias.reshape(1, -1, 1, 1)
    return jnp.tanh(conv[:, :C]) * jax.nn.sigmoid(conv[:, C:])


if __name__ == "__main__":
    # Small shapes consistent with the module: x is (B, C, N, T)
    B, C, N, T = 2, 4, 8, 16
    kernel_size, time_strides = 3, 1

    key = jax.random.PRNGKey(0)
    kx, kw, kb = jax.random.split(key, 3)

    x = jax.random.normal(kx, (B, C, N, T), dtype=jnp.float32)

    # Deterministic Conv2d-style init (kaiming-uniform bound = 1/sqrt(fan_in))
    fan_in = C * 1 * kernel_size
    bound = 1.0 / math.sqrt(fan_in)
    weight = jax.random.uniform(kw, (2 * C, C, 1, kernel_size),
                                minval=-bound, maxval=bound, dtype=jnp.float32)
    bias = jax.random.uniform(kb, (2 * C,),
                              minval=-bound, maxval=bound, dtype=jnp.float32)

    fwd = jax.jit(functools.partial(
        gtu_forward, time_strides=time_strides, kernel_size=kernel_size))
    out = jax.block_until_ready(fwd(x, weight, bias))

    ref = gtu_reference(x, weight, bias,
                        time_strides=time_strides, kernel_size=kernel_size)
    assert out.shape == ref.shape, (out.shape, ref.shape)
    assert jnp.allclose(out, ref, atol=1e-5, rtol=1e-5), "mismatch vs reference"

    print("KERNEL_OK")
</pallas_src>

<mosaic_0001>
module attributes {stable_mosaic.version = 11 : i64} {
  func.func @gtu_kernel(%arg0: i32, %arg1: i32, %arg2: memref<1x4x8x16xf32, #tpu.memory_space<vmem>>, %arg3: memref<24x4xf32, #tpu.memory_space<vmem>>, %arg4: memref<8x1xf32, #tpu.memory_space<vmem>>, %arg5: memref<1x4x8x14xf32, #tpu.memory_space<vmem>>) attributes {dimension_semantics = [#tpu.dimension_semantics<parallel>, #tpu.dimension_semantics<parallel>], iteration_bounds = array<i64: 2, 1>, scalar_prefetch = 0 : i64, scratch_operands = 0 : i64, tpu.core_type = #tpu.core_type<tc>, window_params = [{transform_indices = @transform_0, window_bounds = array<i64: 1, 4, 8, 16>}, {pipeline_mode = #tpu.pipeline_mode<synchronous>, transform_indices = @transform_1, window_bounds = array<i64: 24, 4>}, {pipeline_mode = #tpu.pipeline_mode<synchronous>, transform_indices = @transform_2, window_bounds = array<i64: 8, 1>}, {transform_indices = @transform_3, window_bounds = array<i64: 1, 4, 8, 14>}]} {
    %c0 = arith.constant 0 : index
    %c0_0 = arith.constant 0 : index
    %0 = vector.load %arg3[%c0, %c0_0] : memref<24x4xf32, #tpu.memory_space<vmem>>, vector<24x4xf32>
    %c0_1 = arith.constant 0 : index
    %c0_2 = arith.constant 0 : index
    %1 = vector.load %arg4[%c0_1, %c0_2] : memref<8x1xf32, #tpu.memory_space<vmem>>, vector<8x1xf32>
    %c0_3 = arith.constant 0 : index
    %c0_4 = arith.constant 0 : index
    %c0_5 = arith.constant 0 : index
    %c0_6 = arith.constant 0 : index
    %2 = vector.load %arg2[%c0_3, %c0_4, %c0_5, %c0_6] : memref<1x4x8x16xf32, #tpu.memory_space<vmem>>, vector<1x4x1x16xf32>
    %3 = vector.shape_cast %2 : vector<1x4x1x16xf32> to vector<4x16xf32>
    %cst = arith.constant dense<0.000000e+00> : vector<24x16xf32>
    %4 = tpu.matmul %0, %3, %cst {dimension_numbers = #tpu.dot_dimension_numbers<[1], [0], [0], [1], [0, 0, 1, 1], [], []>} : vector<24x4xf32>, vector<4x16xf32>, vector<24x16xf32> -> vector<24x16xf32>
    %5 = vector.extract_strided_slice %4 {offsets = [0, 0], sizes = [8, 14], strides = [1, 1]} : vector<24x16xf32> to vector<8x14xf32>
    %6 = vector.broadcast %1 : vector<8x1xf32> to vector<8x14xf32>
    %7 = arith.addf %6, %5 : vector<8x14xf32>
    %8 = vector.extract_strided_slice %4 {offsets = [8, 1], sizes = [8, 14], strides = [1, 1]} : vector<24x16xf32> to vector<8x14xf32>
    %9 = arith.addf %7, %8 : vector<8x14xf32>
    %10 = vector.extract_strided_slice %4 {offsets = [16, 2], sizes = [8, 14], strides = [1, 1]} : vector<24x16xf32> to vector<8x14xf32>
    %11 = arith.addf %9, %10 : vector<8x14xf32>
    %12 = vector.extract_strided_slice %11 {offsets = [0, 0], sizes = [4, 14], strides = [1, 1]} : vector<8x14xf32> to vector<4x14xf32>
    %13 = math.tanh %12 : vector<4x14xf32>
    %14 = vector.extract_strided_slice %11 {offsets = [4, 0], sizes = [4, 14], strides = [1, 1]} : vector<8x14xf32> to vector<4x14xf32>
    %15 = arith.negf %14 : vector<4x14xf32>
    %16 = math.exp %15 : vector<4x14xf32>
    %cst_7 = arith.constant 1.000000e+00 : f32
    %17 = vector.broadcast %cst_7 : f32 to vector<4x14xf32>
    %18 = arith.addf %17, %16 : vector<4x14xf32>
    %19 = arith.divf %17, %18 : vector<4x14xf32>
    %20 = arith.mulf %13, %19 : vector<4x14xf32>
    %c0_8 = arith.constant 0 : index
    %c0_9 = arith.constant 0 : index
    %c0_10 = arith.constant 0 : index
    %c0_11 = arith.constant 0 : index
    %21 = vector.load %arg5[%c0_8, %c0_9, %c0_10, %c0_11] : memref<1x4x8x14xf32, #tpu.memory_space<vmem>>, vector<1x4x1x14xf32>
    %22 = vector.shape_cast %21 : vector<1x4x1x14xf32> to vector<4x14xf32>
    %23 = vector.shape_cast %20 : vector<4x14xf32> to vector<1x4x1x14xf32>
    tpu.vector_store %arg5[%c0_8, %c0_9, %c0_10, %c0_11], %23 {strides = array<i32>} : memref<1x4x8x14xf32, #tpu.memory_space<vmem>>, vector<1x4x1x14xf32>,
    %c0_12 = arith.constant 0 : index
    %c0_13 = arith.constant 0 : index
    %c1 = arith.constant 1 : index
    %c0_14 = arith.constant 0 : index
    %24 = vector.load %arg2[%c0_12, %c0_13, %c1, %c0_14] : memref<1x4x8x16xf32, #tpu.memory_space<vmem>>, vector<1x4x1x16xf32>
    %25 = vector.shape_cast %24 : vector<1x4x1x16xf32> to vector<4x16xf32>
    %cst_15 = arith.constant dense<0.000000e+00> : vector<24x16xf32>
    %26 = tpu.matmul %0, %25, %cst_15 {dimension_numbers = #tpu.dot_dimension_numbers<[1], [0], [0], [1], [0, 0, 1, 1], [], []>} : vector<24x4xf32>, vector<4x16xf32>, vector<24x16xf32> -> vector<24x16xf32>
    %27 = vector.extract_strided_slice %26 {offsets = [0, 0], sizes = [8, 14], strides = [1, 1]} : vector<24x16xf32> to vector<8x14xf32>
    %28 = vector.broadcast %1 : vector<8x1xf32> to vector<8x14xf32>
    %29 = arith.addf %28, %27 : vector<8x14xf32>
    %30 = vector.extract_strided_slice %26 {offsets = [8, 1], sizes = [8, 14], strides = [1, 1]} : vector<24x16xf32> to vector<8x14xf32>
    %31 = arith.addf %29, %30 : vector<8x14xf32>
    %32 = vector.extract_strided_slice %26 {offsets = [16, 2], sizes = [8, 14], strides = [1, 1]} : vector<24x16xf32> to vector<8x14xf32>
    %33 = arith.addf %31, %32 : vector<8x14xf32>
    %34 = vector.extract_strided_slice %33 {offsets = [0, 0], sizes = [4, 14], strides = [1, 1]} : vector<8x14xf32> to vector<4x14xf32>
    %35 = math.tanh %34 : vector<4x14xf32>
    %36 = vector.extract_strided_slice %33 {offsets = [4, 0], sizes = [4, 14], strides = [1, 1]} : vector<8x14xf32> to vector<4x14xf32>
    %37 = arith.negf %36 : vector<4x14xf32>
    %38 = math.exp %37 : vector<4x14xf32>
    %cst_16 = arith.constant 1.000000e+00 : f32
    %39 = vector.broadcast %cst_16 : f32 to vector<4x14xf32>
    %40 = arith.addf %39, %38 : vector<4x14xf32>
    %41 = arith.divf %39, %40 : vector<4x14xf32>
    %42 = arith.mulf %35, %41 : vector<4x14xf32>
    %c0_17 = arith.constant 0 : index
    %c0_18 = arith.constant 0 : index
    %c1_19 = arith.constant 1 : index
    %c0_20 = arith.constant 0 : index
    %43 = vector.load %arg5[%c0_17, %c0_18, %c1_19, %c0_20] : memref<1x4x8x14xf32, #tpu.memory_space<vmem>>, vector<1x4x1x14xf32>
    %44 = vector.shape_cast %43 : vector<1x4x1x14xf32> to vector<4x14xf32>
    %45 = vector.shape_cast %42 : vector<4x14xf32> to vector<1x4x1x14xf32>
    tpu.vector_store %arg5[%c0_17, %c0_18, %c1_19, %c0_20], %45 {strides = array<i32>} : memref<1x4x8x14xf32, #tpu.memory_space<vmem>>, vector<1x4x1x14xf32>,
    %c0_21 = arith.constant 0 : index
    %c0_22 = arith.constant 0 : index
    %c2 = arith.constant 2 : index
    %c0_23 = arith.constant 0 : index
    %46 = vector.load %arg2[%c0_21, %c0_22, %c2, %c0_23] : memref<1x4x8x16xf32, #tpu.memory_space<vmem>>, vector<1x4x1x16xf32>
    %47 = vector.shape_cast %46 : vector<1x4x1x16xf32> to vector<4x16xf32>
    %cst_24 = arith.constant dense<0.000000e+00> : vector<24x16xf32>
    %48 = tpu.matmul %0, %47, %cst_24 {dimension_numbers = #tpu.dot_dimension_numbers<[1], [0], [0], [1], [0, 0, 1, 1], [], []>} : vector<24x4xf32>, vector<4x16xf32>, vector<24x16xf32> -> vector<24x16xf32>
    %49 = vector.extract_strided_slice %48 {offsets = [0, 0], sizes = [8, 14], strides = [1, 1]} : vector<24x16xf32> to vector<8x14xf32>
    %50 = vector.broadcast %1 : vector<8x1xf32> to vector<8x14xf32>
    %51 = arith.addf %50, %49 : vector<8x14xf32>
    %52 = vector.extract_strided_slice %48 {offsets = [8, 1], sizes = [8, 14], strides = [1, 1]} : vector<24x16xf32> to vector<8x14xf32>
    %53 = arith.addf %51, %52 : vector<8x14xf32>
    %54 = vector.extract_strided_slice %48 {offsets = [16, 2], sizes = [8, 14], strides = [1, 1]} : vector<24x16xf32> to vector<8x14xf32>
    %55 = arith.addf %53, %54 : vector<8x14xf32>
    %56 = vector.extract_strided_slice %55 {offsets = [0, 0], sizes = [4, 14], strides = [1, 1]} : vector<8x14xf32> to vector<4x14xf32>
    %57 = math.tanh %56 : vector<4x14xf32>
    %58 = vector.extract_strided_slice %55 {offsets = [4, 0], sizes = [4, 14], strides = [1, 1]} : vector<8x14xf32> to vector<4x14xf32>
    %59 = arith.negf %58 : vector<4x14xf32>
    %60 = math.exp %59 : vector<4x14xf32>
    %cst_25 = arith.constant 1.000000e+00 : f32
    %61 = vector.broadcast %cst_25 : f32 to vector<4x14xf32>
    %62 = arith.addf %61, %60 : vector<4x14xf32>
    %63 = arith.divf %61, %62 : vector<4x14xf32>
    %64 = arith.mulf %57, %63 : vector<4x14xf32>
    %c0_26 = arith.constant 0 : index
    %c0_27 = arith.constant 0 : index
    %c2_28 = arith.constant 2 : index
    %c0_29 = arith.constant 0 : index
    %65 = vector.load %arg5[%c0_26, %c0_27, %c2_28, %c0_29] : memref<1x4x8x14xf32, #tpu.memory_space<vmem>>, vector<1x4x1x14xf32>
    %66 = vector.shape_cast %65 : vector<1x4x1x14xf32> to vector<4x14xf32>
    %67 = vector.shape_cast %64 : vector<4x14xf32> to vector<1x4x1x14xf32>
    tpu.vector_store %arg5[%c0_26, %c0_27, %c2_28, %c0_29], %67 {strides = array<i32>} : memref<1x4x8x14xf32, #tpu.memory_space<vmem>>, vector<1x4x1x14xf32>,
    %c0_30 = arith.constant 0 : index
    %c0_31 = arith.constant 0 : index
    %c3 = arith.constant 3 : index
    %c0_32 = arith.constant 0 : index
    %68 = vector.load %arg2[%c0_30, %c0_31, %c3, %c0_32] : memref<1x4x8x16xf32, #tpu.memory_space<vmem>>, vector<1x4x1x16xf32>
    %69 = vector.shape_cast %68 : vector<1x4x1x16xf32> to vector<4x16xf32>
    %cst_33 = arith.constant dense<0.000000e+00> : vector<24x16xf32>
    %70 = tpu.matmul %0, %69, %cst_33 {dimension_numbers = #tpu.dot_dimension_numbers<[1], [0], [0], [1], [0, 0, 1, 1], [], []>} : vector<24x4xf32>, vector<4x16xf32>, vector<24x16xf32> -> vector<24x16xf32>
    %71 = vector.extract_strided_slice %70 {offsets = [0, 0], sizes = [8, 14], strides = [1, 1]} : vector<24x16xf32> to vector<8x14xf32>
    %72 = vector.broadcast %1 : vector<8x1xf32> to vector<8x14xf32>
    %73 = arith.addf %72, %71 : vector<8x14xf32>
    %74 = vector.extract_strided_slice %70 {offsets = [8, 1], sizes = [8, 14], strides = [1, 1]} : vector<24x16xf32> to vector<8x14xf32>
    %75 = arith.addf %73, %74 : vector<8x14xf32>
    %76 = vector.extract_strided_slice %70 {offsets = [16, 2], sizes = [8, 14], strides = [1, 1]} : vector<24x16xf32> to vector<8x14xf32>
    %77 = arith.addf %75, %76 : vector<8x14xf32>
    %78 = vector.extract_strided_slice %77 {offsets = [0, 0], sizes = [4, 14], strides = [1, 1]} : vector<8x14xf32> to vector<4x14xf32>
    %79 = math.tanh %78 : vector<4x14xf32>
    %80 = vector.extract_strided_slice %77 {offsets = [4, 0], sizes = [4, 14], strides = [1, 1]} : vector<8x14xf32> to vector<4x14xf32>
    %81 = arith.negf %80 : vector<4x14xf32>
    %82 = math.exp %81 : vector<4x14xf32>
    %cst_34 = arith.constant 1.000000e+00 : f32
    %83 = vector.broadcast %cst_34 : f32 to vector<4x14xf32>
    %84 = arith.addf %83, %82 : vector<4x14xf32>
    %85 = arith.divf %83, %84 : vector<4x14xf32>
    %86 = arith.mulf %79, %85 : vector<4x14xf32>
    %c0_35 = arith.constant 0 : index
    %c0_36 = arith.constant 0 : index
    %c3_37 = arith.constant 3 : index
    %c0_38 = arith.constant 0 : index
    %87 = vector.load %arg5[%c0_35, %c0_36, %c3_37, %c0_38] : memref<1x4x8x14xf32, #tpu.memory_space<vmem>>, vector<1x4x1x14xf32>
    %88 = vector.shape_cast %87 : vector<1x4x1x14xf32> to vector<4x14xf32>
    %89 = vector.shape_cast %86 : vector<4x14xf32> to vector<1x4x1x14xf32>
    tpu.vector_store %arg5[%c0_35, %c0_36, %c3_37, %c0_38], %89 {strides = array<i32>} : memref<1x4x8x14xf32, #tpu.memory_space<vmem>>, vector<1x4x1x14xf32>,
    %c0_39 = arith.constant 0 : index
    %c0_40 = arith.constant 0 : index
    %c4 = arith.constant 4 : index
    %c0_41 = arith.constant 0 : index
    %90 = vector.load %arg2[%c0_39, %c0_40, %c4, %c0_41] : memref<1x4x8x16xf32, #tpu.memory_space<vmem>>, vector<1x4x1x16xf32>
    %91 = vector.shape_cast %90 : vector<1x4x1x16xf32> to vector<4x16xf32>
    %cst_42 = arith.constant dense<0.000000e+00> : vector<24x16xf32>
    %92 = tpu.matmul %0, %91, %cst_42 {dimension_numbers = #tpu.dot_dimension_numbers<[1], [0], [0], [1], [0, 0, 1, 1], [], []>} : vector<24x4xf32>, vector<4x16xf32>, vector<24x16xf32> -> vector<24x16xf32>
    %93 = vector.extract_strided_slice %92 {offsets = [0, 0], sizes = [8, 14], strides = [1, 1]} : vector<24x16xf32> to vector<8x14xf32>
    %94 = vector.broadcast %1 : vector<8x1xf32> to vector<8x14xf32>
    %95 = arith.addf %94, %93 : vector<8x14xf32>
    %96 = vector.extract_strided_slice %92 {offsets = [8, 1], sizes = [8, 14], strides = [1, 1]} : vector<24x16xf32> to vector<8x14xf32>
    %97 = arith.addf %95, %96 : vector<8x14xf32>
    %98 = vector.extract_strided_slice %92 {offsets = [16, 2], sizes = [8, 14], strides = [1, 1]} : vector<24x16xf32> to vector<8x14xf32>
    %99 = arith.addf %97, %98 : vector<8x14xf32>
    %100 = vector.extract_strided_slice %99 {offsets = [0, 0], sizes = [4, 14], strides = [1, 1]} : vector<8x14xf32> to vector<4x14xf32>
    %101 = math.tanh %100 : vector<4x14xf32>
    %102 = vector.extract_strided_slice %99 {offsets = [4, 0], sizes = [4, 14], strides = [1, 1]} : vector<8x14xf32> to vector<4x14xf32>
    %103 = arith.negf %102 : vector<4x14xf32>
    %104 = math.exp %103 : vector<4x14xf32>
    %cst_43 = arith.constant 1.000000e+00 : f32
    %105 = vector.broadcast %cst_43 : f32 to vector<4x14xf32>
    %106 = arith.addf %105, %104 : vector<4x14xf32>
    %107 = arith.divf %105, %106 : vector<4x14xf32>
    %108 = arith.mulf %101, %107 : vector<4x14xf32>
    %c0_44 = arith.constant 0 : index
    %c0_45 = arith.constant 0 : index
    %c4_46 = arith.constant 4 : index
    %c0_47 = arith.constant 0 : index
    %109 = vector.load %arg5[%c0_44, %c0_45, %c4_46, %c0_47] : memref<1x4x8x14xf32, #tpu.memory_space<vmem>>, vector<1x4x1x14xf32>
    %110 = vector.shape_cast %109 : vector<1x4x1x14xf32> to vector<4x14xf32>
    %111 = vector.shape_cast %108 : vector<4x14xf32> to vector<1x4x1x14xf32>
    tpu.vector_store %arg5[%c0_44, %c0_45, %c4_46, %c0_47], %111 {strides = array<i32>} : memref<1x4x8x14xf32, #tpu.memory_space<vmem>>, vector<1x4x1x14xf32>,
    %c0_48 = arith.constant 0 : index
    %c0_49 = arith.constant 0 : index
    %c5 = arith.constant 5 : index
    %c0_50 = arith.constant 0 : index
    %112 = vector.load %arg2[%c0_48, %c0_49, %c5, %c0_50] : memref<1x4x8x16xf32, #tpu.memory_space<vmem>>, vector<1x4x1x16xf32>
    %113 = vector.shape_cast %112 : vector<1x4x1x16xf32> to vector<4x16xf32>
    %cst_51 = arith.constant dense<0.000000e+00> : vector<24x16xf32>
    %114 = tpu.matmul %0, %113, %cst_51 {dimension_numbers = #tpu.dot_dimension_numbers<[1], [0], [0], [1], [0, 0, 1, 1], [], []>} : vector<24x4xf32>, vector<4x16xf32>, vector<24x16xf32> -> vector<24x16xf32>
    %115 = vector.extract_strided_slice %114 {offsets = [0, 0], sizes = [8, 14], strides = [1, 1]} : vector<24x16xf32> to vector<8x14xf32>
    %116 = vector.broadcast %1 : vector<8x1xf32> to vector<8x14xf32>
    %117 = arith.addf %116, %115 : vector<8x14xf32>
    %118 = vector.extract_strided_slice %114 {offsets = [8, 1], sizes = [8, 14], strides = [1, 1]} : vector<24x16xf32> to vector<8x14xf32>
    %119 = arith.addf %117, %118 : vector<8x14xf32>
    %120 = vector.extract_strided_slice %114 {offsets = [16, 2], sizes = [8, 14], strides = [1, 1]} : vector<24x16xf32> to vector<8x14xf32>
    %121 = arith.addf %119, %120 : vector<8x14xf32>
    %122 = vector.extract_strided_slice %121 {offsets = [0, 0], sizes = [4, 14], strides = [1, 1]} : vector<8x14xf32> to vector<4x14xf32>
    %123 = math.tanh %122 : vector<4x14xf32>
    %124 = vector.extract_strided_slice %121 {offsets = [4, 0], sizes = [4, 14], strides = [1, 1]} : vector<8x14xf32> to vector<4x14xf32>
    %125 = arith.negf %124 : vector<4x14xf32>
    %126 = math.exp %125 : vector<4x14xf32>
    %cst_52 = arith.constant 1.000000e+00 : f32
    %127 = vector.broadcast %cst_52 : f32 to vector<4x14xf32>
    %128 = arith.addf %127, %126 : vector<4x14xf32>
    %129 = arith.divf %127, %128 : vector<4x14xf32>
    %130 = arith.mulf %123, %129 : vector<4x14xf32>
    %c0_53 = arith.constant 0 : index
    %c0_54 = arith.constant 0 : index
    %c5_55 = arith.constant 5 : index
    %c0_56 = arith.constant 0 : index
    %131 = vector.load %arg5[%c0_53, %c0_54, %c5_55, %c0_56] : memref<1x4x8x14xf32, #tpu.memory_space<vmem>>, vector<1x4x1x14xf32>
    %132 = vector.shape_cast %131 : vector<1x4x1x14xf32> to vector<4x14xf32>
    %133 = vector.shape_cast %130 : vector<4x14xf32> to vector<1x4x1x14xf32>
    tpu.vector_store %arg5[%c0_53, %c0_54, %c5_55, %c0_56], %133 {strides = array<i32>} : memref<1x4x8x14xf32, #tpu.memory_space<vmem>>, vector<1x4x1x14xf32>,
    %c0_57 = arith.constant 0 : index
    %c0_58 = arith.constant 0 : index
    %c6 = arith.constant 6 : index
    %c0_59 = arith.constant 0 : index
    %134 = vector.load %arg2[%c0_57, %c0_58, %c6, %c0_59] : memref<1x4x8x16xf32, #tpu.memory_space<vmem>>, vector<1x4x1x16xf32>
    %135 = vector.shape_cast %134 : vector<1x4x1x16xf32> to vector<4x16xf32>
    %cst_60 = arith.constant dense<0.000000e+00> : vector<24x16xf32>
    %136 = tpu.matmul %0, %135, %cst_60 {dimension_numbers = #tpu.dot_dimension_numbers<[1], [0], [0], [1], [0, 0, 1, 1], [], []>} : vector<24x4xf32>, vector<4x16xf32>, vector<24x16xf32> -> vector<24x16xf32>
    %137 = vector.extract_strided_slice %136 {offsets = [0, 0], sizes = [8, 14], strides = [1, 1]} : vector<24x16xf32> to vector<8x14xf32>
    %138 = vector.broadcast %1 : vector<8x1xf32> to vector<8x14xf32>
    %139 = arith.addf %138, %137 : vector<8x14xf32>
    %140 = vector.extract_strided_slice %136 {offsets = [8, 1], sizes = [8, 14], strides = [1, 1]} : vector<24x16xf32> to vector<8x14xf32>
    %141 = arith.addf %139, %140 : vector<8x14xf32>
    %142 = vector.extract_strided_slice %136 {offsets = [16, 2], sizes = [8, 14], strides = [1, 1]} : vector<24x16xf32> to vector<8x14xf32>
    %143 = arith.addf %141, %142 : vector<8x14xf32>
    %144 = vector.extract_strided_slice %143 {offsets = [0, 0], sizes = [4, 14], strides = [1, 1]} : vector<8x14xf32> to vector<4x14xf32>
    %145 = math.tanh %144 : vector<4x14xf32>
    %146 = vector.extract_strided_slice %143 {offsets = [4, 0], sizes = [4, 14], strides = [1, 1]} : vector<8x14xf32> to vector<4x14xf32>
    %147 = arith.negf %146 : vector<4x14xf32>
    %148 = math.exp %147 : vector<4x14xf32>
    %cst_61 = arith.constant 1.000000e+00 : f32
    %149 = vector.broadcast %cst_61 : f32 to vector<4x14xf32>
    %150 = arith.addf %149, %148 : vector<4x14xf32>
    %151 = arith.divf %149, %150 : vector<4x14xf32>
    %152 = arith.mulf %145, %151 : vector<4x14xf32>
    %c0_62 = arith.constant 0 : index
    %c0_63 = arith.constant 0 : index
    %c6_64 = arith.constant 6 : index
    %c0_65 = arith.constant 0 : index
    %153 = vector.load %arg5[%c0_62, %c0_63, %c6_64, %c0_65] : memref<1x4x8x14xf32, #tpu.memory_space<vmem>>, vector<1x4x1x14xf32>
    %154 = vector.shape_cast %153 : vector<1x4x1x14xf32> to vector<4x14xf32>
    %155 = vector.shape_cast %152 : vector<4x14xf32> to vector<1x4x1x14xf32>
    tpu.vector_store %arg5[%c0_62, %c0_63, %c6_64, %c0_65], %155 {strides = array<i32>} : memref<1x4x8x14xf32, #tpu.memory_space<vmem>>, vector<1x4x1x14xf32>,
    %c0_66 = arith.constant 0 : index
    %c0_67 = arith.constant 0 : index
    %c7 = arith.constant 7 : index
    %c0_68 = arith.constant 0 : index
    %156 = vector.load %arg2[%c0_66, %c0_67, %c7, %c0_68] : memref<1x4x8x16xf32, #tpu.memory_space<vmem>>, vector<1x4x1x16xf32>
    %157 = vector.shape_cast %156 : vector<1x4x1x16xf32> to vector<4x16xf32>
    %cst_69 = arith.constant dense<0.000000e+00> : vector<24x16xf32>
    %158 = tpu.matmul %0, %157, %cst_69 {dimension_numbers = #tpu.dot_dimension_numbers<[1], [0], [0], [1], [0, 0, 1, 1], [], []>} : vector<24x4xf32>, vector<4x16xf32>, vector<24x16xf32> -> vector<24x16xf32>
    %159 = vector.extract_strided_slice %158 {offsets = [0, 0], sizes = [8, 14], strides = [1, 1]} : vector<24x16xf32> to vector<8x14xf32>
    %160 = vector.broadcast %1 : vector<8x1xf32> to vector<8x14xf32>
    %161 = arith.addf %160, %159 : vector<8x14xf32>
    %162 = vector.extract_strided_slice %158 {offsets = [8, 1], sizes = [8, 14], strides = [1, 1]} : vector<24x16xf32> to vector<8x14xf32>
    %163 = arith.addf %161, %162 : vector<8x14xf32>
    %164 = vector.extract_strided_slice %158 {offsets = [16, 2], sizes = [8, 14], strides = [1, 1]} : vector<24x16xf32> to vector<8x14xf32>
    %165 = arith.addf %163, %164 : vector<8x14xf32>
    %166 = vector.extract_strided_slice %165 {offsets = [0, 0], sizes = [4, 14], strides = [1, 1]} : vector<8x14xf32> to vector<4x14xf32>
    %167 = math.tanh %166 : vector<4x14xf32>
    %168 = vector.extract_strided_slice %165 {offsets = [4, 0], sizes = [4, 14], strides = [1, 1]} : vector<8x14xf32> to vector<4x14xf32>
    %169 = arith.negf %168 : vector<4x14xf32>
    %170 = math.exp %169 : vector<4x14xf32>
    %cst_70 = arith.constant 1.000000e+00 : f32
    %171 = vector.broadcast %cst_70 : f32 to vector<4x14xf32>
    %172 = arith.addf %171, %170 : vector<4x14xf32>
    %173 = arith.divf %171, %172 : vector<4x14xf32>
    %174 = arith.mulf %167, %173 : vector<4x14xf32>
    %c0_71 = arith.constant 0 : index
    %c0_72 = arith.constant 0 : index
    %c7_73 = arith.constant 7 : index
    %c0_74 = arith.constant 0 : index
    %175 = vector.load %arg5[%c0_71, %c0_72, %c7_73, %c0_74] : memref<1x4x8x14xf32, #tpu.memory_space<vmem>>, vector<1x4x1x14xf32>
    %176 = vector.shape_cast %175 : vector<1x4x1x14xf32> to vector<4x14xf32>
    %177 = vector.shape_cast %174 : vector<4x14xf32> to vector<1x4x1x14xf32>
    tpu.vector_store %arg5[%c0_71, %c0_72, %c7_73, %c0_74], %177 {strides = array<i32>} : memref<1x4x8x14xf32, #tpu.memory_space<vmem>>, vector<1x4x1x14xf32>,
    return
  }
  func.func @transform_0(%arg0: i32, %arg1: i32) -> (i32, i32, i32, i32) {
    %c0_i32 = arith.constant 0 : i32
    %c0_i32_0 = arith.constant 0 : i32
    %c0_i32_1 = arith.constant 0 : i32
    return %arg0, %c0_i32, %arg1, %c0_i32_0 : i32, i32, i32, i32
  }
  func.func @transform_1(%arg0: i32, %arg1: i32) -> (i32, i32) {
    %c0_i32 = arith.constant 0 : i32
    %c0_i32_0 = arith.constant 0 : i32
    %c0_i32_1 = arith.constant 0 : i32
    return %c0_i32, %c0_i32_0 : i32, i32
  }
  func.func @transform_2(%arg0: i32, %arg1: i32) -> (i32, i32) {
    %c0_i32 = arith.constant 0 : i32
    %c0_i32_0 = arith.constant 0 : i32
    %c0_i32_1 = arith.constant 0 : i32
    return %c0_i32, %c0_i32_0 : i32, i32
  }
  func.func @transform_3(%arg0: i32, %arg1: i32) -> (i32, i32, i32, i32) {
    %c0_i32 = arith.constant 0 : i32
    %c0_i32_0 = arith.constant 0 : i32
    %c0_i32_1 = arith.constant 0 : i32
    return %arg0, %c0_i32, %arg1, %c0_i32_0 : i32, i32, i32, i32
  }
}

</mosaic_0001>

<bundles_post_ra>
// kernel: gtu_forward.1
= control target key start
LH: loop header
LB: loop body
LE: loop exit
PB: predicated region body
PF: predicated region fallthrough
CT: control target
= control target key end

     0   :  { %8 = vsyncpa [#allocation3], 0  ;;  %s2381_s0 = inlined_call_operand.vmem [shape: f32[2,4,8,16], index: 0, kind: input, shape index: {}]   ;;  %s2382_s1 = inlined_call_operand.vmem [shape: f32[24,4], index: 1, kind: input, shape index: {}]   ;;  %s2383_s2 = inlined_call_operand.vmem [shape: f32[8,1], index: 2, kind: input, shape index: {}]   ;;  %s2384_s3 = inlined_call_operand.hbm [shape: f32[2,4,8,14], index: 3, kind: output, shape index: {}]  }
   0x1   :  { %10 = vsyncpa [#allocation3 + $0x1], 0  ;;  %s1915_s12 = smov 0   ;;  %s1917_s13 = smov 0  }
   0x2   :  { %s1919_s14 = smov 0   ;;  %s1921_s15 = smov 0  }
   0x3   :  { %s1923_s16 = smov 0   ;;  %s1925_s17 = smov 0  }
   0x4 LB: > { %s1519_s18 = sadd.s32 4294967295, %s1884_s17   ;;  %s1520_s19 = sadd.s32 4294967294, %s1884_s17   ;;  %s1884_s17 = sphi %s1925_s17, %s16_s17   ;;  %s1880_s16 = sphi %s1923_s16, %s2391_s16   ;;  %s1876_s15 = sphi %s1921_s15, %s2390_s15   ;;  %s1872_s14 = sphi %s1919_s14, %s2389_s14   ;;  %s1868_s13 = sphi %s1917_s13, %s2388_s13   ;;  %s1864_s12 = sphi %s1915_s12, %s2387_s12  }
   0x5   : > { %s28_s20 = sadd.s32 1, %s1880_s16  ;;  %s107_s21 = sadd.s32 1, %s1872_s14 }
   0x6   : > { %p30_p0 = scmp.ge.s32.totalorder %s28_s20, 2  ;;  %p117_p1 = scmp.ne.s32.totalorder %s1872_s14, %s1868_s13 }
   0x7   : > { %p118_p2 = scmp.eq.s32.totalorder %s1519_s18, 1  ;;  %p123_p3 = scmp.ne.s32.totalorder %s1868_s13, %s1864_s12 }
   0x8   : > { %s2393_s20 = smov (%p30_p0, %s28_s20), 0  ;;  %p124_p5 = scmp.eq.s32.totalorder %s1520_s19, 1 }
   0x9   : > { %p1955_p4 = por %p118_p2, %p117_p1  ;;  %s102_s23 = ssub.s32 %s1880_s16, %s2393_s20 }
   0xa   : > { %p1523_p6 = scmp.ge.s32.totalorder %s1884_s17, 1  ;;  %p105_p7 = scmp.eq.s32.totalorder %s102_s23, 0 }
   0xb   : > { %p1962_p8 = por %p124_p5, %p123_p3  ;;  %p159_p9 = scmp.lt.s32.totalorder %s1884_s17, 3 }
   0xc   : > { %s1968_s25 = scalar_select %p105_p7, %s1872_s14, %s107_s21  }
   0xd   : > { %p160_p10 = pnand %p1523_p6, %p159_p9 }
   0xe   : > { %p186_p11 = scmp.lt.s32.totalorder (!%p160_p10), %s1876_s15, 1  ;;  %v1886_v0 = vmov (!%p160_p10), 0.0   ;;  %vm1887_vm0 = vmmov (!%p160_p10), 0   ;;  %v197_v1 = vld [vmem:[%s2383_s2] sm:$0xff] (!%p160_p10)  ;;  %v1888_v2 = vmov (!%p160_p10), 0   ;;  %vm207_vm1 = vcmask (!%p160_p10), 1041409  }
   0xf   : > { %163 = sbr.rel (%p160_p10) target bundleno = 461 (0x1cd), region = 32  ;;  %1606 = vmatprep.subr.mxu0 (!%p160_p10), %v1886_v0  ;;  %1617 = vmatprep.subr.mxu1 (!%p160_p10), %v1886_v0  ;;  %vm210_vm2 = vcmask (!%p160_p10), 1042434   ;;  %vm213_vm3 = vcmask (!%p160_p10), 1043459   ;;  %vm225_vm4 = vcmask (!%p160_p10), 1043456   ;;  %v1996_v13 = vld [vmem:[%s2382_s1] sm:$0xff] (!%p160_p10)  ;;  %vm215_vm5 = vcmask (!%p160_p10), 31744  }
  0x10   : > { %1608 = vmatprep.mubr.msk.f32.mxu0 (!%p160_p10), %vm1887_vm0, %v1886_v0  ;;  %1619 = vmatprep.mubr.msk.f32.mxu1 (!%p160_p10), %vm1887_vm0, %v1886_v0  ;;  %v2026_v41 = vld [vmem:[%s2382_s1 + $0x8] sm:$0xff] (!%p160_p10)  ;;  %v2054_v56 = vld [vmem:[%s2382_s1 + $0x10] sm:$0xff] (!%p160_p10)  ;;  %s1889_s18 = smov (!%p160_p10), 127   ;;  %s1890_s19 = smov (!%p160_p10), 126   ;;  %vm364_vm6 = vcmask (!%p160_p10), 106496  }
  0x11   : > { %1757 = vset.pattern.permute.xlu0 (!%p160_p10), %v1888_v2  ;;  %s183_s21 = sand.u32 (!%p160_p10), 1, %s1868_s13   ;;  %s1573_s27 = sshll.u32 (!%p160_p10), %s1876_s15, 9 }
  0x12   : > { %310 = vperm.xlu0 (!%p160_p10), %1757, %v197_v1   ;;  %s1524_s23 = sshll.u32 (!%p160_p10), %s183_s21, 5  ;;  %s2321_s4 = scalar_lea.hbm (!%p160_p10), %s2384_s3, %s1573_s27 }
  0x13   : > { %s1892_s6 = smov (!%p160_p10), [#allocation2]  }
  0x14   : > { %s1810_s7 = sshll.u32 (!%p160_p10), %s1892_s6, 4  ;;  %s1811_s7 = int_to_ptr.vmem [resolvable:$false] %s1810_s7 }
  0x15   : > { %s1812_s8 = scalar_lea.vmem (!%p160_p10), %s1811_s7, 1024 }
  0x16   : > { %s187_s26 = scalar_select %p186_p11, %s1876_s15, 1 }
  0x17   : > { %s2335_s15 = scalar_lea.sflag [#allocation3], %s183_s21 }
  0x18   : > { %s1572_s29 = sshll.u32 %s187_s26, 5  ;;  %s2231_s26 = scalar_lea.vmem [#allocation2], %s1524_s23 }
  0x19   : > { %s1984_s5 = scalar_lea.vmem %s2381_s0, %s1572_s29  ;;  %s1441_s28 = sshll.u32 %s2231_s26, 4  ;;  %s2323_s28 = int_to_ptr.vmem [resolvable:$true] %s1441_s28 }
  0x1a   : > { %v198_v3 = vld [vmem:[%s1984_s5] sm:$0x1]  ;;  %v199_v4 = vld [vmem:[%s1984_s5 + $0x8] sm:$0x1]  ;;  %v200_v5 = vld [vmem:[%s1984_s5 + $0x10] sm:$0x1]  ;;  %p1813_p1 = scmp.lt.s32.totalorder %s2323_s28, %s1811_s7 }
  0x1b   : > { %v201_v6 = vld [vmem:[%s1984_s5 + $0x18] sm:$0x1]  ;;  %v206_v7 = vrot.slane %v199_v4, 7  ;;  %v209_v8 = vrot.slane %v200_v5, 6  ;;  %v369_v9 = vld [vmem:[%s1984_s5 + $0x1] sm:$0x1] }
  0x1c   : > { %v212_v10 = vrot.slane %v201_v6, 5  ;;  %v370_v11 = vld [vmem:[%s1984_s5 + $0x9] sm:$0x1]  ;;  %v371_v12 = vld [vmem:[%s1984_s5 + $0x11] sm:$0x1] }
  0x1d   : > { %v208_v14 = vsel %vm207_vm1, %v206_v7, %v198_v3  ;;  %v372_v15 = vld [vmem:[%s1984_s5 + $0x19] sm:$0x1]  ;;  %v377_v16 = vrot.slane %v370_v11, 7  ;;  %v379_v17 = vrot.slane %v371_v12, 6  ;;  %v520_v18 = vld [vmem:[%s1984_s5 + $0x2] sm:$0x1] }
  0x1e   : > { %v211_v19 = vsel %vm210_vm2, %v209_v8, %v208_v14  ;;  %v381_v20 = vrot.slane %v372_v15, 5  ;;  %v521_v21 = vld [vmem:[%s1984_s5 + $0xa] sm:$0x1]  ;;  %v522_v22 = vld [vmem:[%s1984_s5 + $0x12] sm:$0x1] }
  0x1f   : > { %v214_v23 = vsel %vm213_vm3, %v212_v10, %v211_v19  ;;  %v378_v24 = vsel %vm207_vm1, %v377_v16, %v369_v9  ;;  %v523_v25 = vld [vmem:[%s1984_s5 + $0x1a] sm:$0x1]  ;;  %v528_v26 = vrot.slane %v521_v21, 7  ;;  %v530_v27 = vrot.slane %v522_v22, 6  ;;  %v671_v28 = vld [vmem:[%s1984_s5 + $0x3] sm:$0x1] }
  0x20   : > { %1607 = vmatpush3.msk.msra.mxu0 %vm225_vm4, %v214_v23  ;;  %v380_v29 = vsel %vm210_vm2, %v379_v17, %v378_v24  ;;  %v532_v30 = vrot.slane %v523_v25, 5  ;;  %v672_v31 = vld [vmem:[%s1984_s5 + $0xb] sm:$0x1]  ;;  %v673_v32 = vld [vmem:[%s1984_s5 + $0x13] sm:$0x1] }
  0x21   : > { %v382_v33 = vsel %vm213_vm3, %v381_v20, %v380_v29  ;;  %1609 = vmatmul.mubr.msk.f32.vlgmr.msra.gmra.mrb[0].mxu0 %vm215_vm5, %v1996_v13  ;;  %1628 = vmatprep.subr.mxu0 %v1886_v0  ;;  %v529_v34 = vsel %vm207_vm1, %v528_v26, %v520_v18  ;;  %v674_v35 = vld [vmem:[%s1984_s5 + $0x1b] sm:$0x1]  ;;  %v679_v36 = vrot.slane %v672_v31, 7  ;;  %v681_v37 = vrot.slane %v673_v32, 6  ;;  %v822_v38 = vld [vmem:[%s1984_s5 + $0x4] sm:$0x1] }
  0x22   : > { %1618 = vmatpush3.msk.msra.mxu1 %vm225_vm4, %v382_v33  ;;  %v531_v39 = vsel %vm210_vm2, %v530_v27, %v529_v34  ;;  %v683_v40 = vrot.slane %v674_v35, 5  ;;  %1611 = vmatprep.mubr.msk.f32.mxu0 %vm1887_vm0, %v1886_v0  ;;  %v823_v42 = vld [vmem:[%s1984_s5 + $0xc] sm:$0x1]  ;;  %v824_v43 = vld [vmem:[%s1984_s5 + $0x14] sm:$0x1] }
  0x23   : > { %1620 = vmatmul.mubr.msk.f32.vlgmr.msra.gmra.mrb[0].mxu1 %vm215_vm5, %v1996_v13  ;;  %1639 = vmatprep.subr.mxu1 %v1886_v0  ;;  %v533_v44 = vsel %vm213_vm3, %v532_v30, %v531_v39  ;;  %v680_v45 = vsel %vm207_vm1, %v679_v36, %v671_v28  ;;  %v825_v46 = vld [vmem:[%s1984_s5 + $0x1c] sm:$0x1]  ;;  %v830_v47 = vrot.slane %v823_v42, 7  ;;  %v832_v48 = vrot.slane %v824_v43, 6  ;;  %v973_v50 = vld [vmem:[%s1984_s5 + $0x5] sm:$0x1] }
  0x24   : > { %1629 = vmatpush3.msk.msra.mxu0 %vm225_vm4, %v533_v44  ;;  %v682_v49 = vsel %vm210_vm2, %v681_v37, %v680_v45  ;;  %1622 = vmatprep.mubr.msk.f32.mxu1 %vm1887_vm0, %v1886_v0  ;;  %v974_v51 = vld [vmem:[%s1984_s5 + $0xd] sm:$0x1]  ;;  %v975_v52 = vld [vmem:[%s1984_s5 + $0x15] sm:$0x1]  ;;  %v976_v57 = vld [vmem:[%s1984_s5 + $0x1d] sm:$0x1] }
  0x25   : > { %v684_v53 = vsel %vm213_vm3, %v683_v40, %v682_v49  ;;  %1612 = vmatmul.mubr.msk.f32.gmra.mrb[2].mxu0 %vm215_vm5, %v2026_v41  ;;  %1650 = vmatprep.subr.mxu0 %v1886_v0  ;;  %v831_v54 = vsel %vm207_vm1, %v830_v47, %v822_v38  ;;  %v981_v55 = vrot.slane %v974_v51, 7  ;;  %v983_v58 = vrot.slane %v975_v52, 6  ;;  %v1125_v1 = vld [vmem:[%s1984_s5 + $0xe] sm:$0x1]  ;;  %v1276_v3 = vld [vmem:[%s1984_s5 + $0xf] sm:$0x1] }
  0x26   : > { %1640 = vmatpush3.msk.msra.mxu1 %vm225_vm4, %v684_v53  ;;  %1614 = vmatprep.mubr.msk.f32.mxu0 %vm1887_vm0, %v1886_v0  ;;  %v834_v59 = vrot.slane %v825_v46, 5  ;;  %v833_v61 = vsel %vm210_vm2, %v832_v48, %v831_v54  ;;  %v985_v62 = vrot.slane %v976_v57, 5  ;;  %v1126_v5 = vld [vmem:[%s1984_s5 + $0x16] sm:$0x1]  ;;  %v1132_v6 = vrot.slane %v1125_v1, 7 }
  0x27   : > { %1623 = vmatmul.mubr.msk.f32.gmra.mrb[2].mxu1 %vm215_vm5, %v2026_v41  ;;  %1661 = vmatprep.subr.mxu1 %v1886_v0  ;;  %v982_v60 = vsel %vm207_vm1, %v981_v55, %v973_v50  ;;  %v1124_v7 = vld [vmem:[%s1984_s5 + $0x6] sm:$0x1]  ;;  %v1277_v8 = vld [vmem:[%s1984_s5 + $0x17] sm:$0x1]  ;;  %v1283_v9 = vrot.slane %v1276_v3, 7  ;;  %v1134_v11 = vrot.slane %v1126_v5, 6 }
  0x28   : > { %1625 = vmatprep.mubr.msk.f32.mxu1 %vm1887_vm0, %v1886_v0  ;;  %v984_v63 = vsel %vm210_vm2, %v983_v58, %v982_v60  ;;  %v835_v2 = vsel %vm213_vm3, %v834_v59, %v833_v61  ;;  %v1127_v10 = vld [vmem:[%s1984_s5 + $0x1e] sm:$0x1]  ;;  %v1275_v12 = vld [vmem:[%s1984_s5 + $0x7] sm:$0x1]  ;;  %v1133_v14 = vsel %vm207_vm1, %v1132_v6, %v1124_v7  ;;  %v1278_v15 = vld [vmem:[%s1984_s5 + $0x1f] sm:$0x1] }
  0x29   : > { %1615 = vmatmul.mubr.msk.f32.gmra.mrb[4].mxu0 %vm215_vm5, %v2054_v56  ;;  %v986_v4 = vsel %vm213_vm3, %v985_v62, %v984_v63  ;;  %v1285_v16 = vrot.slane %v1277_v8, 6  ;;  %v1136_v17 = vrot.slane %v1127_v10, 5  ;;  %v1284_v18 = vsel %vm207_vm1, %v1283_v9, %v1275_v12  ;;  %s1806_s5 = scalar_lea.vmem %s2323_s28, 512 }
  0x2a   : > { %1630 = vmatprep.mubr.msk.f32.mxu0 %vm1887_vm0, %v1886_v0  ;;  %v1135_v19 = vsel %vm210_vm2, %v1134_v11, %v1133_v14  ;;  %v1287_v20 = vrot.slane %v1278_v15, 5  ;;  %p1807_p12 = scmp.ne.s32.totalorder %s2323_s28, %s1806_s5  ;;  %p1814_p2 = scmp.lt.s32.totalorder %s1812_s8, %s1806_s5 }
  0x2b   : > { %1626 = vmatmul.mubr.msk.f32.gmra.mrb[4].mxu1 %vm215_vm5, %v2054_v56  ;;  %v1286_v21 = vsel %vm210_vm2, %v1285_v16, %v1284_v18  ;;  %v1137_v22 = vsel %vm213_vm3, %v1136_v17, %v1135_v19 }
  0x2c   : > { %1641 = vmatprep.mubr.msk.f32.mxu1 %vm1887_vm0, %v1886_v0  ;;  %v1288_v23 = vsel %vm213_vm3, %v1287_v20, %v1286_v21  ;;  %p1808_p13 = pnand %p1807_p12, %p1955_p4  ;;  %p1815_p3 = por %p1814_p2, %p1813_p1 }
  0x2d   : > { %1631 = vmatmul.mubr.msk.f32.vlgmr.msra.gmra.mrb[6].mxu0 %vm215_vm5, %v1996_v13 }
  0x2e   : > { %1651 = vmatpush3.msk.msra.mxu0 %vm225_vm4, %v835_v2  ;;  %1633 = vmatprep.mubr.msk.f32.mxu0 %vm1887_vm0, %v1886_v0  ;;  %p1809_p0 = pneg %p1808_p13 }
  0x2f   : > { %1642 = vmatmul.mubr.msk.f32.vlgmr.msra.gmra.mrb[6].mxu1 %vm215_vm5, %v1996_v13  ;;  %1672 = vmatprep.subr.mxu0 %v1886_v0 }
  0x30   : > { %1662 = vmatpush3.msk.msra.mxu1 %vm225_vm4, %v986_v4  ;;  %1644 = vmatprep.mubr.msk.f32.mxu1 %vm1887_vm0, %v1886_v0  ;;  %p1816_p5 = pnand %p1815_p3, %p1809_p0 }
  0x31   : > { %1634 = vmatmul.mubr.msk.f32.gmra.mrb[8].mxu0 %vm215_vm5, %v2026_v41  ;;  %1683 = vmatprep.subr.mxu1 %v1886_v0 }
  0x32   : > { %1636 = vmatprep.mubr.msk.f32.mxu0 %vm1887_vm0, %v1886_v0 }
  0x33   : > { %1645 = vmatmul.mubr.msk.f32.gmra.mrb[8].mxu1 %vm215_vm5, %v2026_v41 }
  0x34   : > { %1647 = vmatprep.mubr.msk.f32.mxu1 %vm1887_vm0, %v1886_v0 }
  0x35   : > { %1637 = vmatmul.mubr.msk.f32.gmra.mrb[10].mxu0 %vm215_vm5, %v2054_v56 }
  0x36   : > { %1652 = vmatprep.mubr.msk.f32.mxu0 %vm1887_vm0, %v1886_v0 }
  0x37   : > { %1648 = vmatmul.mubr.msk.f32.gmra.mrb[10].mxu1 %vm215_vm5, %v2054_v56 }
  0x38   : > { %1663 = vmatprep.mubr.msk.f32.mxu1 %vm1887_vm0, %v1886_v0 }
  0x39   : > { %1653 = vmatmul.mubr.msk.f32.vlgmr.msra.gmra.mrb[12].mxu0 %vm215_vm5, %v1996_v13 }
  0x3a   : > { %1673 = vmatpush3.msk.msra.mxu0 %vm225_vm4, %v1137_v22  ;;  %1655 = vmatprep.mubr.msk.f32.mxu0 %vm1887_vm0, %v1886_v0 }
  0x3b   : > { %1664 = vmatmul.mubr.msk.f32.vlgmr.msra.gmra.mrb[12].mxu1 %vm215_vm5, %v1996_v13 }
  0x3c   : > { %1684 = vmatpush3.msk.msra.mxu1 %vm225_vm4, %v1288_v23  ;;  %1666 = vmatprep.mubr.msk.f32.mxu1 %vm1887_vm0, %v1886_v0 }
  0x3d   : > { %1656 = vmatmul.mubr.msk.f32.gmra.mrb[14].mxu0 %vm215_vm5, %v2026_v41 }
  0x3e   : > { %1658 = vmatprep.mubr.msk.f32.mxu0 %vm1887_vm0, %v1886_v0 }
  0x3f   : > { %1667 = vmatmul.mubr.msk.f32.gmra.mrb[14].mxu1 %vm215_vm5, %v2026_v41 }
  0x40   : > { %1669 = vmatprep.mubr.msk.f32.mxu1 %vm1887_vm0, %v1886_v0 }
  0x41   : > { %1659 = vmatmul.mubr.msk.f32.gmra.mrb[16].mxu0 %vm215_vm5, %v2054_v56 }
  0x42   : > { %1674 = vmatprep.mubr.msk.f32.mxu0 %vm1887_vm0, %v1886_v0 }
  0x43   : > { %1670 = vmatmul.mubr.msk.f32.gmra.mrb[16].mxu1 %vm215_vm5, %v2054_v56 }
  0x44   : > { %1685 = vmatprep.mubr.msk.f32.mxu1 %vm1887_vm0, %v1886_v0 }
  0x45   : > { %1675 = vmatmul.mubr.msk.f32.vlgmr.msra.gmra.mrb[18].mxu0 %vm215_vm5, %v1996_v13 }
  0x46   : > { %1677 = vmatprep.mubr.msk.f32.mxu0 %vm1887_vm0, %v1886_v0 }
  0x47   : > { %1686 = vmatmul.mubr.msk.f32.vlgmr.msra.gmra.mrb[18].mxu1 %vm215_vm5, %v1996_v13 }
  0x48   : > { %1688 = vmatprep.mubr.msk.f32.mxu1 %vm1887_vm0, %v1886_v0 }
  0x49   : > { %1678 = vmatmul.mubr.msk.f32.gmra.mrb[20].mxu0 %vm215_vm5, %v2026_v41 }
  0x4a   : > { %1680 = vmatprep.mubr.msk.f32.mxu0 %vm1887_vm0, %v1886_v0 }
  0x4b   : > { %1689 = vmatmul.mubr.msk.f32.gmra.mrb[20].mxu1 %vm215_vm5, %v2026_v41 }
  0x4c   : > { %1691 = vmatprep.mubr.msk.f32.mxu1 %vm1887_vm0, %v1886_v0 }
  0x4d   : > { %1681 = vmatmul.mubr.msk.f32.gmra.mrb[22].mxu0 %vm215_vm5, %v2054_v56 }
  0x4f   : > { %1692 = vmatmul.mubr.msk.f32.gmra.mrb[22].mxu1 %vm215_vm5, %v2054_v56 }
  0x91   : > { %v2195_v7 = vpop.permute.xlu0 %310 }
  0xf4   : > { %v2163_v13 = vpop.f32.mrb[0].mxu0 }
  0xf5   : > { %v1610_v24 = vpop.f32.mrb[1].mxu0  ;;  %v313_v11 = vadd.f32 %v2195_v7, %v2163_v13 }
  0xf6   : > { %v2165_v25 = vpop.f32.mrb[0].mxu1 }
  0xf7   : > { %v1621_v26 = vpop.f32.mrb[1].mxu1  ;;  %v465_v10 = vadd.f32 %v2165_v25, %v2195_v7 }
  0xf8   : > { %v299_v27 = vpop.f32.mrb[2].mxu0 }
  0xf9   : > { %315 = vrot.lane.b32.xlu0 %v299_v27, %s1889_s18  ;;  %v1613_v28 = vpop.f32.mrb[3].mxu0 }
  0xfa   : > { %v456_v29 = vpop.f32.mrb[2].mxu1 }
  0xfb   : > { %467 = vrot.lane.b32.xlu1 %v456_v29, %s1889_s18  ;;  %v1624_v0 = vpop.f32.mrb[3].mxu1 }
  0xfc   : > { %v304_v30 = vpop.f32.mrb[4].mxu0 }
  0xfd   : > { %v1616_v31 = vpop.f32.mrb[5].mxu0 }
  0xfe   : > { %v461_v32 = vpop.f32.mrb[4].mxu1 }
  0xff   : > { %v1627_v33 = vpop.f32.mrb[5].mxu1  ;;  %472 = vrot.lane.b32.xlu0 %v461_v32, %s1890_s19  ;;  %320 = vrot.lane.b32.xlu1 %v304_v30, %s1890_s19 }
 0x100   : > { %v2171_v34 = vpop.f32.mrb[6].mxu0 }
 0x101   : > { %v1632_v35 = vpop.f32.mrb[7].mxu0  ;;  %v616_v22 = vadd.f32 %v2171_v34, %v2195_v7 }
 0x102   : > { %v2173_v36 = vpop.f32.mrb[6].mxu1 }
 0x103   : > { %v1643_v37 = vpop.f32.mrb[7].mxu1  ;;  %v767_v24 = vadd.f32 %v2173_v36, %v2195_v7  ;;  %v339_v36 = vlaneseq }
 0x104   : > { %v607_v38 = vpop.f32.mrb[8].mxu0 }
 0x105   : > { %618 = vrot.lane.b32.xlu1 %v607_v38, %s1889_s18  ;;  %v1635_v39 = vpop.f32.mrb[9].mxu0 }
 0x106   : > { %v758_v40 = vpop.f32.mrb[8].mxu1 }
 0x107   : > { %v1646_v41 = vpop.f32.mrb[9].mxu1  ;;  %769 = vrot.lane.b32.xlu0 %v758_v40, %s1889_s18  ;;  %v1891_v40 = vmov 1966171168  }
 0x108   : > { %v612_v42 = vpop.f32.mrb[10].mxu0  ;;  %v337_v41 = vunpack.c.l.s4 %v1891_v40 }
 0x109   : > { %623 = vrot.lane.b32.xlu1 %v612_v42, %s1890_s19  ;;  %v1638_v43 = vpop.f32.mrb[11].mxu0 }
 0x10a   : > { %v763_v44 = vpop.f32.mrb[10].mxu1 }
 0x10b   : > { %v1649_v45 = vpop.f32.mrb[11].mxu1  ;;  %774 = vrot.lane.b32.xlu0 %v763_v44, %s1890_s19 }
 0x10c   : > { %v2179_v46 = vpop.f32.mrb[12].mxu0 }
 0x10d   : > { %v1654_v47 = vpop.f32.mrb[13].mxu0  ;;  %v918_v37 = vadd.f32 %v2179_v46, %v2195_v7 }
 0x10e   : > { %v2181_v48 = vpop.f32.mrb[12].mxu1 }
 0x10f   : > { %v1665_v49 = vpop.f32.mrb[13].mxu1  ;;  %v1069_v39 = vadd.f32 %v2181_v48, %v2195_v7 }
 0x110   : > { %v909_v50 = vpop.f32.mrb[14].mxu0  ;;  %v338_v49 = vunpack.c.0.s8 %v337_v41 }
 0x111   : > { %920 = vrot.lane.b32.xlu1 %v909_v50, %s1889_s18  ;;  %v1657_v51 = vpop.f32.mrb[15].mxu0  ;;  %v340_v50 = vshrl.u32 %v339_v36, 7 }
 0x112   : > { %v1060_v52 = vpop.f32.mrb[14].mxu1 }
 0x113   : > { %v1668_v53 = vpop.f32.mrb[15].mxu1  ;;  %1071 = vrot.lane.b32.xlu0 %v1060_v52, %s1889_s18 }
 0x114   : > { %v914_v54 = vpop.f32.mrb[16].mxu0 }
 0x115   : > { %925 = vrot.lane.b32.xlu1 %v914_v54, %s1890_s19  ;;  %v1660_v55 = vpop.f32.mrb[17].mxu0 }
 0x116   : > { %v1065_v56 = vpop.f32.mrb[16].mxu1 }
 0x117   : > { %v1671_v57 = vpop.f32.mrb[17].mxu1  ;;  %1076 = vrot.lane.b32.xlu0 %v1065_v56, %s1890_s19 }
 0x118   : > { %v2187_v58 = vpop.f32.mrb[18].mxu0 }
 0x119   : > { %v1676_v59 = vpop.f32.mrb[19].mxu0 }
 0x11a   : > { %v2189_v60 = vpop.f32.mrb[18].mxu1  ;;  %v2216_v59 = vsub.s32 %v338_v49, %v340_v50 }
 0x11b   : > { %v1687_v61 = vpop.f32.mrb[19].mxu1 }
 0x11c   : > { %v1211_v62 = vpop.f32.mrb[20].mxu0 }
 0x11d   : > { %1222 = vrot.lane.b32.xlu1 %v1211_v62, %s1889_s18  ;;  %v1679_v63 = vpop.f32.mrb[21].mxu0 }
 0x11e   : > { %v1362_v1 = vpop.f32.mrb[20].mxu1 }
 0x11f   : > { %v1690_v2 = vpop.f32.mrb[21].mxu1  ;;  %1373 = vrot.lane.b32.xlu0 %v1362_v1, %s1889_s18 }
 0x120   : > { %v1216_v3 = vpop.f32.mrb[22].mxu0 }
 0x121   : > { %1227 = vrot.lane.b32.xlu1 %v1216_v3, %s1890_s19  ;;  %v1682_v4 = vpop.f32.mrb[23].mxu0  ;;  %v1220_v3 = vadd.f32 %v2187_v58, %v2195_v7 }
 0x122   : > { %v1367_v5 = vpop.f32.mrb[22].mxu1 }
 0x123   : > { %v1693_v6 = vpop.f32.mrb[23].mxu1  ;;  %1378 = vrot.lane.b32.xlu0 %v1367_v5, %s1890_s19 }
 0x16b   : > { %v316_v8 = vpop.permute.xlu0 %315 }
 0x16c   : > { %v318_v14 = vadd.f32 %v316_v8, %v313_v11  ;;  %v1371_v8 = vadd.f32 %v2189_v60, %v2195_v7 }
 0x16d   : > { %v468_v9 = vpop.permute.xlu1 %467 }
 0x16e   : > { %v470_v12 = vadd.f32 %v468_v9, %v465_v10 }
 0x171   : > { %v473_v15 = vpop.permute.xlu0 %472  ;;  %v321_v16 = vpop.permute.xlu1 %320 }
 0x172   : > { %v475_v17 = vadd.f32 %v473_v15, %v470_v12  ;;  %v323_v18 = vadd.f32 %v321_v16, %v318_v14 }
 0x174   : > { %v1536_v19 = vmul.f32 -1.442695, %v475_v17  ;;  %v1531_v20 = vmul.f32 -1.442695, %v323_v18 }
 0x176   : > { %1758 = vpow2.f32 %v1536_v19 }
 0x177   : > { %1760 = vpow2.f32 %v1531_v20  ;;  %v619_v21 = vpop.permute.xlu1 %618 }
 0x178   : > { %v621_v25 = vadd.f32 %v619_v21, %v616_v22 }
 0x179   : > { %v770_v23 = vpop.permute.xlu0 %769 }
 0x17a   : > { %v772_v26 = vadd.f32 %v770_v23, %v767_v24 }
 0x17b   : > { %v624_v13 = vpop.permute.xlu1 %623 }
 0x17c   : > { %v626_v27 = vadd.f32 %v624_v13, %v621_v25 }
 0x17d   : > { %v775_v28 = vpop.permute.xlu0 %774 }
 0x17e   : > { %v777_v29 = vadd.f32 %v775_v28, %v772_v26  ;;  %v1541_v0 = vmul.f32 -1.442695, %v626_v27 }
 0x180   : > { %v1759_v30 = vpop.eup %1758  ;;  %v1546_v31 = vmul.f32 -1.442695, %v777_v29  ;;  %1762 = vpow2.f32 %v1541_v0 }
 0x181   : > { %v1761_v32 = vpop.eup %1760  ;;  %v480_v33 = vadd.f32 1.0, %v1759_v30 }
 0x182   : > { %v328_v35 = vadd.f32 1.0, %v1761_v32  ;;  %1764 = vpow2.f32 %v1546_v31 }
 0x183   : > { %1766 = vrcp.f32 %v480_v33  ;;  %v921_v34 = vpop.permute.xlu1 %920 }
 0x184   : > { %1768 = vrcp.f32 %v328_v35  ;;  %v923_v42 = vadd.f32 %v921_v34, %v918_v37 }
 0x185   : > { %1770 = vtanh.f32 %v475_v17  ;;  %v1072_v38 = vpop.permute.xlu0 %1071 }
 0x186   : > { %1772 = vtanh.f32 %v323_v18  ;;  %v1074_v44 = vadd.f32 %v1072_v38, %v1069_v39 }
 0x187   : > { %v926_v43 = vpop.permute.xlu1 %925  ;;  %1774 = vtanh.f32 %v626_v27 }
 0x188   : > { %v2209_v45 = vadd.f32 %v926_v43, %v923_v42 }
 0x189   : > { %v1077_v47 = vpop.permute.xlu0 %1076 }
 0x18a   : > { %v2211_v46 = vadd.f32 %v1077_v47, %v1074_v44  ;;  %v1551_v51 = vmul.f32 -1.442695, %v2209_v45  ;;  %v1763_v52 = vpop.eup %1762 }
 0x18b   : > { %v631_v48 = vadd.f32 1.0, %v1763_v52 }
 0x18c   : > { %v1765_v53 = vpop.eup %1764  ;;  %v1556_v54 = vmul.f32 -1.442695, %v2211_v46  ;;  %1776 = vpow2.f32 %v1551_v51 }
 0x18d   : > { %v1767_v55 = vpop.eup %1766  ;;  %v782_v56 = vadd.f32 1.0, %v1765_v53  ;;  %1778 = vrcp.f32 %v631_v48 }
 0x18e   : > { %v1769_v57 = vpop.eup %1768  ;;  %v484_v61 = vrot.slane %v1767_v55, 4 }
 0x18f   : > { %v1771_v62 = vpop.eup %1770  ;;  %v332_v63 = vrot.slane %v1769_v57, 4  ;;  %1780 = vrcp.f32 %v782_v56  ;;  %v1223_v1 = vpop.permute.xlu1 %1222 }
 0x190   : > { %v1773_v2 = vpop.eup %1772  ;;  %v486_v4 = vmul.f32 %v1771_v62, %v484_v61  ;;  %1782 = vpow2.f32 %v1556_v54  ;;  %v1225_v10 = vadd.f32 %v1223_v1, %v1220_v3 }
 0x191   : > { %v334_v5 = vmul.f32 %v1773_v2, %v332_v63  ;;  %1784 = vtanh.f32 %v777_v29  ;;  %v1374_v6 = vpop.permute.xlu0 %1373  ;;  %v1775_v20 = vpop.eup %1774 }
 0x192   : > { %v494_v9 = vrot.slane %v486_v4, %v2216_v59  ;;  %v1376_v15 = vadd.f32 %v1374_v6, %v1371_v8 }
 0x193   : > { %v342_v11 = vrot.slane %v334_v5, %v2216_v59  ;;  %v1228_v12 = vpop.permute.xlu1 %1227 }
 0x194   : > { %v495_v14 = vcombine.high %v494_v9, %v494_v9  ;;  %v502_v58 = vrot.slane %v494_v9, %v2216_v59  ;;  %v2227_v16 = vadd.f32 %v1228_v12, %v1225_v10 }
 0x195   : > { %v343_v17 = vcombine.high %v342_v11, %v342_v11  ;;  %v350_v18 = vrot.slane %v342_v11, %v2216_v59  ;;  %v1379_v19 = vpop.permute.xlu0 %1378 }
 0x196   : > { %v509_v60 = vrot.slane %v495_v14, %v2216_v59  ;;  %v510_v7 = vcombine.high %v502_v58, %v502_v58  ;;  %516 = vst.msk [vmem:[%s2231_s26 + $0x1] sm:$0x1] %vm364_vm6, %v502_v58  ;;  %v2235_v21 = vadd.f32 %v1379_v19, %v1376_v15  ;;  %v1777_v22 = vpop.eup %1776  ;;  %v1561_v25 = vmul.f32 -1.442695, %v2227_v16 }
 0x197   : > { %v357_v23 = vrot.slane %v343_v17, %v2216_v59  ;;  %v358_v24 = vcombine.high %v350_v18, %v350_v18  ;;  %365 = vst.msk [vmem:[%s2231_s26] sm:$0x1] %vm364_vm6, %v350_v18  ;;  %v1779_v13 = vpop.eup %1778  ;;  %v933_v27 = vadd.f32 1.0, %v1777_v22 }
 0x198   : > { %v511_v26 = vcombine.high %v509_v60, %v509_v60  ;;  %517 = vst.msk [vmem:[%s2231_s26 + $0x9] sm:$0x1] %vm364_vm6, %v509_v60  ;;  %518 = vst.msk [vmem:[%s2231_s26 + $0x11] sm:$0x1] %vm364_vm6, %v510_v7  ;;  %v1566_v28 = vmul.f32 -1.442695, %v2235_v21  ;;  %1786 = vpow2.f32 %v1561_v25 }
 0x199   : > { %v1781_v29 = vpop.eup %1780  ;;  %v359_v0 = vcombine.high %v357_v23, %v357_v23  ;;  %366 = vst.msk [vmem:[%s2231_s26 + $0x8] sm:$0x1] %vm364_vm6, %v357_v23  ;;  %367 = vst.msk [vmem:[%s2231_s26 + $0x10] sm:$0x1] %vm364_vm6, %v358_v24  ;;  %v635_v30 = vrot.slane %v1779_v13, 4  ;;  %1788 = vrcp.f32 %v933_v27 }
 0x19a   : > { %v1783_v31 = vpop.eup %1782  ;;  %519 = vst.msk [vmem:[%s2231_s26 + $0x19] sm:$0x1] %vm364_vm6, %v511_v26  ;;  %v786_v32 = vrot.slane %v1781_v29, 4  ;;  %1790 = vpow2.f32 %v1566_v28 }
 0x19b   : > { %v1785_v33 = vpop.eup %1784  ;;  %368 = vst.msk [vmem:[%s2231_s26 + $0x18] sm:$0x1] %vm364_vm6, %v359_v0  ;;  %v637_v35 = vmul.f32 %v1775_v20, %v635_v30  ;;  %v1084_v34 = vadd.f32 1.0, %v1783_v31  ;;  %1792 = vtanh.f32 %v2209_v45 }
 0x19c   : > { %v788_v37 = vmul.f32 %v1785_v33, %v786_v32 }
 0x19d   : > { %v645_v36 = vrot.slane %v637_v35, %v2216_v59  ;;  %1794 = vrcp.f32 %v1084_v34 }
 0x19e   : > { %v796_v38 = vrot.slane %v788_v37, %v2216_v59  ;;  %1796 = vtanh.f32 %v2211_v46 }
 0x19f   : > { %v646_v39 = vcombine.high %v645_v36, %v645_v36  ;;  %v653_v40 = vrot.slane %v645_v36, %v2216_v59 }
 0x1a0   : > { %v797_v41 = vcombine.high %v796_v38, %v796_v38  ;;  %v804_v42 = vrot.slane %v796_v38, %v2216_v59 }
 0x1a1   : > { %v660_v43 = vrot.slane %v646_v39, %v2216_v59  ;;  %v661_v44 = vcombine.high %v653_v40, %v653_v40  ;;  %667 = vst.msk [vmem:[%s2231_s26 + $0x2] sm:$0x1] %vm364_vm6, %v653_v40 }
 0x1a2   : > { %v811_v45 = vrot.slane %v797_v41, %v2216_v59  ;;  %v812_v47 = vcombine.high %v804_v42, %v804_v42  ;;  %818 = vst.msk [vmem:[%s2231_s26 + $0x3] sm:$0x1] %vm364_vm6, %v804_v42  ;;  %v1787_v49 = vpop.eup %1786 }
 0x1a3   : > { %v662_v50 = vcombine.high %v660_v43, %v660_v43  ;;  %668 = vst.msk [vmem:[%s2231_s26 + $0xa] sm:$0x1] %vm364_vm6, %v660_v43  ;;  %669 = vst.msk [vmem:[%s2231_s26 + $0x12] sm:$0x1] %vm364_vm6, %v661_v44  ;;  %v1789_v46 = vpop.eup %1788  ;;  %v1235_v52 = vadd.f32 1.0, %v1787_v49 }
 0x1a4   : > { %v813_v51 = vcombine.high %v811_v45, %v811_v45  ;;  %819 = vst.msk [vmem:[%s2231_s26 + $0xb] sm:$0x1] %vm364_vm6, %v811_v45  ;;  %820 = vst.msk [vmem:[%s2231_s26 + $0x13] sm:$0x1] %vm364_vm6, %v812_v47  ;;  %v1791_v53 = vpop.eup %1790  ;;  %v937_v48 = vrot.slane %v1789_v46, 4 }
 0x1a5   : > { %670 = vst.msk [vmem:[%s2231_s26 + $0x1a] sm:$0x1] %vm364_vm6, %v662_v50  ;;  %v1793_v54 = vpop.eup %1792  ;;  %v1386_v55 = vadd.f32 1.0, %v1791_v53  ;;  %1798 = vrcp.f32 %v1235_v52 }
 0x1a6   : > { %821 = vst.msk [vmem:[%s2231_s26 + $0x1b] sm:$0x1] %vm364_vm6, %v813_v51  ;;  %v939_v57 = vmul.f32 %v1793_v54, %v937_v48  ;;  %1800 = vtanh.f32 %v2227_v16 }
 0x1a7   : > { %v1795_v56 = vpop.eup %1794  ;;  %1802 = vrcp.f32 %v1386_v55 }
 0x1a8   : > { %v1088_v61 = vrot.slane %v1795_v56, 4  ;;  %v1797_v62 = vpop.eup %1796  ;;  %v947_v63 = vrot.slane %v939_v57, %v2216_v59  ;;  %1804 = vtanh.f32 %v2235_v21 }
 0x1aa   : > { %v1090_v1 = vmul.f32 %v1797_v62, %v1088_v61  ;;  %v948_v2 = vcombine.high %v947_v63, %v947_v63  ;;  %v955_v3 = vrot.slane %v947_v63, %v2216_v59 }
 0x1ac   : > { %v1098_v4 = vrot.slane %v1090_v1, %v2216_v59  ;;  %v962_v5 = vrot.slane %v948_v2, %v2216_v59  ;;  %v963_v6 = vcombine.high %v955_v3, %v955_v3  ;;  %969 = vst.msk [vmem:[%s2231_s26 + $0x4] sm:$0x1] %vm364_vm6, %v955_v3 }
 0x1ae   : > { %v1099_v8 = vcombine.high %v1098_v4, %v1098_v4  ;;  %v1106_v9 = vrot.slane %v1098_v4, %v2216_v59  ;;  %v964_v10 = vcombine.high %v962_v5, %v962_v5  ;;  %970 = vst.msk [vmem:[%s2231_s26 + $0xc] sm:$0x1] %vm364_vm6, %v962_v5  ;;  %971 = vst.msk [vmem:[%s2231_s26 + $0x14] sm:$0x1] %vm364_vm6, %v963_v6 }
 0x1af   : > { %v1799_v11 = vpop.eup %1798 }
 0x1b0   : > { %v1113_v12 = vrot.slane %v1099_v8, %v2216_v59  ;;  %v1114_v14 = vcombine.high %v1106_v9, %v1106_v9  ;;  %1120 = vst.msk [vmem:[%s2231_s26 + $0x5] sm:$0x1] %vm364_vm6, %v1106_v9  ;;  %v1801_v58 = vpop.eup %1800  ;;  %972 = vst.msk [vmem:[%s2231_s26 + $0x1c] sm:$0x1] %vm364_vm6, %v964_v10  ;;  %v1239_v15 = vrot.slane %v1799_v11, 4 }
 0x1b1   : > { %v1803_v16 = vpop.eup %1802 }
 0x1b2   : > { %v1115_v17 = vcombine.high %v1113_v12, %v1113_v12  ;;  %1121 = vst.msk [vmem:[%s2231_s26 + $0xd] sm:$0x1] %vm364_vm6, %v1113_v12  ;;  %1122 = vst.msk [vmem:[%s2231_s26 + $0x15] sm:$0x1] %vm364_vm6, %v1114_v14  ;;  %v1390_v18 = vrot.slane %v1803_v16, 4  ;;  %v1241_v19 = vmul.f32 %v1801_v58, %v1239_v15  ;;  %v1805_v20 = vpop.eup %1804 }
 0x1b4   : > { %1123 = vst.msk [vmem:[%s2231_s26 + $0x1d] sm:$0x1] %vm364_vm6, %v1115_v17  ;;  %v1392_v60 = vmul.f32 %v1805_v20, %v1390_v18  ;;  %v1249_v7 = vrot.slane %v1241_v19, %v2216_v59 }
 0x1b6   : > { %v1400_v21 = vrot.slane %v1392_v60, %v2216_v59  ;;  %v1250_v22 = vcombine.high %v1249_v7, %v1249_v7  ;;  %v1257_v23 = vrot.slane %v1249_v7, %v2216_v59 }
 0x1b8   : > { %v1401_v24 = vcombine.high %v1400_v21, %v1400_v21  ;;  %v1408_v25 = vrot.slane %v1400_v21, %v2216_v59  ;;  %v1264_v13 = vrot.slane %v1250_v22, %v2216_v59  ;;  %v1265_v26 = vcombine.high %v1257_v23, %v1257_v23  ;;  %1271 = vst.msk [vmem:[%s2231_s26 + $0x6] sm:$0x1] %vm364_vm6, %v1257_v23 }
 0x1ba   : > { %v1415_v27 = vrot.slane %v1401_v24, %v2216_v59  ;;  %v1416_v28 = vcombine.high %v1408_v25, %v1408_v25  ;;  %1422 = vst.msk [vmem:[%s2231_s26 + $0x7] sm:$0x1] %vm364_vm6, %v1408_v25  ;;  %v1266_v29 = vcombine.high %v1264_v13, %v1264_v13  ;;  %1272 = vst.msk [vmem:[%s2231_s26 + $0xe] sm:$0x1] %vm364_vm6, %v1264_v13 }
 0x1bb   : > { %1273 = vst.msk [vmem:[%s2231_s26 + $0x16] sm:$0x1] %vm364_vm6, %v1265_v26 }
 0x1bc   : > { %v1417_v59 = vcombine.high %v1415_v27, %v1415_v27  ;;  %1423 = vst.msk [vmem:[%s2231_s26 + $0xf] sm:$0x1] %vm364_vm6, %v1415_v27  ;;  %1424 = vst.msk [vmem:[%s2231_s26 + $0x17] sm:$0x1] %vm364_vm6, %v1416_v28 }
 0x1bd   : > { %1274 = vst.msk [vmem:[%s2231_s26 + $0x1e] sm:$0x1] %vm364_vm6, %v1266_v29 }
 0x1be   : > { %1425 = vst.msk [vmem:[%s2231_s26 + $0x1f] sm:$0x1] %vm364_vm6, %v1417_v59 }
 0x1bf   : > { %1819 = shalt.err (!%p1816_p5)
}
 0x1c0   : > { %s1820_s9 = scalar_lea.hbm %s2321_s4, 512  ;;  %s1824_s18 = scalar_lea.hbm %s2384_s3, 1024 }
 0x1c1   : > { %p1821_p6 = scmp.ne.s32.totalorder %s2321_s4, %s1820_s9  ;;  %p1825_p10 = scmp.lt.u32.totalorder %s2321_s4, %s2384_s3 }
 0x1c2   : > { %p1826_p11 = scmp.lt.u32.totalorder %s1824_s18, %s1820_s9  ;;  %p1828_p13 = scmp.lt.u32.totalorder %s1820_s9, %s2321_s4 }
 0x1c3   : > { %p1822_p7 = pnand %p1821_p6, %p1955_p4 }
 0x1c4   : > { %p1827_p12 = por %p1826_p11, %p1825_p10 }
 0x1c5   : > { %p1823_p9 = pneg %p1822_p7 }
 0x1c6   : > { %p1829_p0 = por %p1828_p13, %p1827_p12 }
 0x1c8   : > { %p1830_p1 = pnand %p1829_p0, %p1823_p9 }
 0x1ca   : > { %1833 = shalt.err (!%p1830_p1)
}
 0x1cb   : > { %s1893_s23 = smov 128   ;;  %s1894_s26 = smov 8  }
 0x1cc   : > { %1694 = dma.vmem_to_hbm [thread:$0]  (%p1955_p4), %s2323_s28, 512, %s2321_s4, %s2335_s15, %s1893_s23, %s1893_s23, %s1894_s26  }
 0x1cd PF: > { %p1700_p2 = scmp.ge.s32.totalorder %s1884_s17, 2  ;;  %s1456_s27 = sand.u32 1, %s1864_s12  }
 0x1ce   : > { %s1457_s29 = scalar_lea.sflag [#allocation3], %s1456_s27 }
 0x1cf   : > { %p1697_p3 = pnand %p1700_p2, %p1962_p8 }
 0x1d1   : > { %1859 = dma.done.wait (!%p1697_p3), %s1457_s29, 512  }
 0x1d2   : > { %1861 = vsyncadd (!%p1697_p3), %s1457_s29, 4294966784  ;;  %s16_s17 = sadd.s32 1, %s1884_s17   ;;  %s2387_s12 = smov %s1868_s13 }
 0x1d3   : > { %p13_p5 = scmp.ge.s32.totalorder %s16_s17, 4   ;;  %s2388_s13 = smov %s1872_s14 }
 0x1d4   : > { %s2389_s14 = smov %s1968_s25  ;;  %s2390_s15 = smov %s1880_s16 }
 0x1d5   : > { %s2391_s16 = smov %s2393_s20  ;;  %15 = sbr.rel (!%p13_p5) target bundleno = 4 (0x4), region = 67 }
 0x1dc   :  { %1462 = vsyncpa [#allocation3], 1 }
 0x1dd   :  { %1464 = vsyncpa [#allocation3 + $0x1], 1 }

</bundles_post_ra>
